<compile_context>
chip_gen: v7x
topology: tpu7x:2x2x1
jax: 0.10.0
libtpu: 0.0.40
codegen_flags: <defaults>
</compile_context>

<pallas_src>
import functools

import jax
import jax.numpy as jnp
from jax.experimental import pallas as pl
from jax.experimental.pallas import tpu as pltpu


def _pick_tiles(H, W, N, max_lanes=16384, min_steps=4):
    """Choose (tile_hw, halo) for the flattened H*W lane axis.

    halo   : multiple of 128, >= W+1 (covers every 3x3 tap shift), divides HW.
    tile_hw: multiple of halo (hence of 128), divides HW, as large as possible
             while keeping N * (HW / tile_hw) >= min_steps grid steps.
    Falls back to (HW, HW) (whole image per step) for awkward sizes.
    """
    HW = H * W
    limit = min(HW, max_lanes)
    halo = None
    h = max(128, ((W + 1 + 127) // 128) * 128)
    while h <= limit:
        if HW % h == 0:
            halo = h
            break
        h += 128
    if halo is None:
        return HW, HW                                     # degenerate fallback
    cands = [t for t in range(halo, limit + 1, halo) if HW % t == 0]
    good = [t for t in cands if N * (HW // t) >= min_steps]
    return (max(good) if good else max(cands)), halo


def _conv_kernel(xp_ref, xc_ref, xn_ref, w_ref, o_ref, patch_ref, *,
                 H, W, C_in, KH, KW, pad, tile_hw, halo, compute_dtype):
    # xp_ref : (1, C_in, halo)     tail of the previous lane tile (clamped)
    # xc_ref : (1, C_in, tile_hw)  this lane tile
    # xn_ref : (1, C_in, halo)     head of the next lane tile (clamped)
    # w_ref  : (C_out, K+1)        im2col weights, last column = bias
    # o_ref  : (1, C_out, tile_hw) lane-dense output tile
    # patch_ref : (K+1, tile_hw)   per-tile im2col patch scratch (+ ones row)
    HW = H * W
    K = KH * KW * C_in
    r = pl.program_id(1)
    lane0 = r * tile_hw                                  # first pixel of the tile

    # Halo'd slab of the image: [prev tail | this tile | next head].
    slab = jnp.concatenate([xp_ref[0], xc_ref[0], xn_ref[0]], axis=1)
    slab_len = tile_hw + 2 * halo

    # Border (zero-padding) masks, computed in-kernel -- no HBM index input.
    j = jax.lax.broadcasted_iota(jnp.int32, (1, tile_hw), 1)
    p = j + lane0                                        # flattened pixel index
    # col = p % W without vector integer div/mod (exact for p < 2**24).
    q = (p.astype(jnp.float32) * (1.0 / W)).astype(jnp.int32)
    col = p - q * W
    col = jnp.where(col < 0, col + W, col)
    col = jnp.where(col >= W, col - W, col)
    not_top = p >= W                                     # row > 0     (dh = -1)
    not_bot = p < HW - W                                 # row < H - 1 (dh = +1)
    not_lft = col >= 1                                   # col > 0     (dw = -1)
    not_rgt = col <= W - 2                               # col < W - 1 (dw = +1)

    for kh in range(KH):                                 # 9 static taps
        dh = kh - pad
        for kw in range(KW):
            dw = kw - pad
            s = dh * W + dw                              # flat lane shift of tap
            if s == 0:
                sh = xc_ref[0]
            else:
                # XLU roll of the slab, then an aligned slice of the tile window.
                rolled = pltpu.roll(slab, shift=(-s) % slab_len, axis=1)
                sh = rolled[:, halo:halo + tile_hw]
            conds = []
            if dh < 0:
                conds.append(not_top)
            if dh > 0:
                conds.append(not_bot)
            if dw < 0:
                conds.append(not_lft)
            if dw > 0:
                conds.append(not_rgt)
            if conds:
                valid = conds[0]
                for c in conds[1:]:
                    valid = jnp.logical_and(valid, c)
                sh = jnp.where(valid, sh, 0)             # implicit zero padding
            t = kh * KW + kw
            patch_ref[t * C_in:(t + 1) * C_in, :] = sh.astype(compute_dtype)

    # Ones row folds the bias into the single matmul (last column of w_ref).
    patch_ref[K:K + 1, :] = jnp.ones((1, tile_hw), compute_dtype)

    # One deep matmul per lane-dense tile: (C_out, K+1) @ (K+1, tile_hw).
    acc = jnp.dot(w_ref[...], patch_ref[...], preferred_element_type=jnp.float32)
    o_ref[0] = acc.astype(o_ref.dtype)


def conv2d_wrapper_forward(x_nchw, weight, bias, *, stride=1, padding=1,
                           resolution=None, compute_dtype=jnp.float32):
    """Pallas equivalent of Conv2dWrapper.forward (resolution flag is absorbed).

    x_nchw : (N, C_in, H, W)
    weight : (C_out, C_in, KH, KW)   (PyTorch OIHW layout)
    bias   : (C_out,)
    returns: (N, C_out, H, W)
    """
    del resolution
    N, C_in, H, W = x_nchw.shape
    C_out, C_in_w, KH, KW = weight.shape
    assert C_in_w == C_in
    # TODO(synk): generalize to stride > 1 / dilation / groups; the module's
    # chosen kwargs are kernel_size=3, stride=1, padding=1 ("same").
    assert stride == 1 and KH == KW and 2 * padding == KH - 1, \
        "kernel implements stride=1 'same' convolutions only"

    HW = H * W
    K = KH * KW * C_in

    # Free layout views + tiny parameter reshuffles (no activation HBM round trip).
    x_flat = x_nchw.reshape(N, C_in, HW)
    # w_mat[co, (kh*KW + kw)*C_in + ci] = weight[co, ci, kh, kw]; last col = bias.
    w_mat = jnp.transpose(weight, (0, 2, 3, 1)).reshape(C_out, K)
    w_mat = jnp.concatenate([w_mat, bias.reshape(C_out, 1)], axis=1)
    w_mat = w_mat.astype(compute_dtype)

    tile_hw, halo = _pick_tiles(H, W, N)
    R = HW // tile_hw
    ratio = tile_hw // halo                              # halo blocks per tile
    n_hb = HW // halo                                    # halo blocks along HW

    kernel = functools.partial(
        _conv_kernel, H=H, W=W, C_in=C_in, KH=KH, KW=KW, pad=padding,
        tile_hw=tile_hw, halo=halo, compute_dtype=compute_dtype)

    # VMEM budget from the actual per-step footprint (double-buffered blocks,
    # patch scratch, roll temporaries) with headroom -- not a hardcoded 32 MiB.
    in_bpe = x_nchw.dtype.itemsize
    cd_bpe = jnp.dtype(compute_dtype).itemsize
    slab = C_in * (tile_hw + 2 * halo)
    footprint = (2 * slab * in_bpe                       # xp/xc/xn double-buffered
                 + 2 * C_out * tile_hw * in_bpe          # output tile
                 + (K + 1) * tile_hw * cd_bpe            # patch scratch
                 + KH * KW * slab * in_bpe               # rolled-slab temporaries
                 + 2 * C_out * (K + 1) * cd_bpe)         # weights
    vmem_limit = int(min(100 * 2 ** 20, max(16 * 2 ** 20, 2 * footprint)))

    out_flat = pl.pallas_call(
        kernel,
        out_shape=jax.ShapeDtypeStruct((N, C_out, HW), x_nchw.dtype),
        grid=(N, R),
        in_specs=[
            # Tail of the previous lane tile (halo), clamped at the image start;
            # the clamped duplicate is only read at masked (zero-padded) taps.
            pl.BlockSpec((1, C_in, halo),
                         lambda n, r: (n, 0, jnp.maximum(r * ratio - 1, 0))),
            # The lane tile itself.
            pl.BlockSpec((1, C_in, tile_hw), lambda n, r: (n, 0, r)),
            # Head of the next lane tile (halo), clamped at the image end.
            pl.BlockSpec((1, C_in, halo),
                         lambda n, r: (n, 0, jnp.minimum((r + 1) * ratio, n_hb - 1))),
            # im2col weights with folded bias column (tiny, resident).
            pl.BlockSpec((C_out, K + 1), lambda n, r: (0, 0)),
        ],
        out_specs=pl.BlockSpec((1, C_out, tile_hw), lambda n, r: (n, 0, r)),
        scratch_shapes=[pltpu.VMEM((K + 1, tile_hw), compute_dtype)],
        compiler_params=pltpu.CompilerParams(
            # No cross-step state -> both grid axes are parallel (v7x 2-TC split
            # even at batch size 1).
            dimension_semantics=("parallel", "parallel"),
            vmem_limit_bytes=vmem_limit),
    )(x_flat, x_flat, x_flat, w_mat)

    return out_flat.reshape(N, C_out, H, W)              # free reshape back to NCHW


if __name__ == "__main__":
    key = jax.random.PRNGKey(0)
    k_x, k_w, k_b = jax.random.split(key, 3)

    # Small shapes consistent with the module: dim_in=4 -> dim_out=8, 3x3 conv,
    # stride 1, padding 1, bias=True.
    N, C_in, H, W = 2, 4, 16, 16
    C_out, KH, KW = 8, 3, 3

    x = jax.random.normal(k_x, (N, C_in, H, W), dtype=jnp.float32)
    fan_in = C_in * KH * KW
    bound = 1.0 / jnp.sqrt(fan_in)
    weight = jax.random.uniform(k_w, (C_out, C_in, KH, KW),
                                minval=-bound, maxval=bound, dtype=jnp.float32)
    bias = jax.random.uniform(k_b, (C_out,),
                              minval=-bound, maxval=bound, dtype=jnp.float32)

    fwd = jax.jit(lambda xx, ww, bb: conv2d_wrapper_forward(xx, ww, bb, padding=1))
    out = jax.block_until_ready(fwd(x, weight, bias))

    # Reference: XLA conv with the same semantics as nn.Conv2d.
    ref = jax.lax.conv_general_dilated(
        x, weight, window_strides=(1, 1), padding=((1, 1), (1, 1)),
        dimension_numbers=("NCHW", "OIHW", "NCHW"))
    ref = ref + bias.reshape(1, C_out, 1, 1)

    assert out.shape == (N, C_out, H, W), out.shape
    max_err = float(jnp.max(jnp.abs(out - ref)))
    assert jnp.allclose(out, ref, atol=1e-3, rtol=1e-3), max_err

    print("KERNEL_OK")
</pallas_src>

<mosaic_0001>
module attributes {stable_mosaic.version = 11 : i64} {
  func.func @_conv_kernel(%arg0: i32, %arg1: i32, %arg2: memref<1x4x128xf32, #tpu.memory_space<vmem>>, %arg3: memref<1x4x128xf32, #tpu.memory_space<vmem>>, %arg4: memref<1x4x128xf32, #tpu.memory_space<vmem>>, %arg5: memref<8x37xf32, #tpu.memory_space<vmem>>, %arg6: memref<1x8x128xf32, #tpu.memory_space<vmem>>, %arg7: memref<37x128xf32, #tpu.memory_space<vmem>>) attributes {dimension_semantics = [#tpu.dimension_semantics<parallel>, #tpu.dimension_semantics<parallel>], iteration_bounds = array<i64: 2, 2>, scalar_prefetch = 0 : i64, scratch_operands = 1 : i64, tpu.core_type = #tpu.core_type<tc>, window_params = [{transform_indices = @transform_0, window_bounds = array<i64: 1, 4, 128>}, {transform_indices = @transform_1, window_bounds = array<i64: 1, 4, 128>}, {transform_indices = @transform_2, window_bounds = array<i64: 1, 4, 128>}, {pipeline_mode = #tpu.pipeline_mode<synchronous>, transform_indices = @transform_3, window_bounds = array<i64: 8, 37>}, {transform_indices = @transform_4, window_bounds = array<i64: 1, 8, 128>}]} {
    %c128_i32 = arith.constant 128 : i32
    %0 = arith.muli %arg1, %c128_i32 : i32
    %c0 = arith.constant 0 : index
    %c0_0 = arith.constant 0 : index
    %c0_1 = arith.constant 0 : index
    %1 = vector.load %arg2[%c0, %c0_0, %c0_1] : memref<1x4x128xf32, #tpu.memory_space<vmem>>, vector<1x4x128xf32>
    %2 = vector.shape_cast %1 : vector<1x4x128xf32> to vector<4x128xf32>
    %c0_2 = arith.constant 0 : index
    %c0_3 = arith.constant 0 : index
    %c0_4 = arith.constant 0 : index
    %3 = vector.load %arg3[%c0_2, %c0_3, %c0_4] : memref<1x4x128xf32, #tpu.memory_space<vmem>>, vector<1x4x128xf32>
    %4 = vector.shape_cast %3 : vector<1x4x128xf32> to vector<4x128xf32>
    %c0_5 = arith.constant 0 : index
    %c0_6 = arith.constant 0 : index
    %c0_7 = arith.constant 0 : index
    %5 = vector.load %arg4[%c0_5, %c0_6, %c0_7] : memref<1x4x128xf32, #tpu.memory_space<vmem>>, vector<1x4x128xf32>
    %6 = vector.shape_cast %5 : vector<1x4x128xf32> to vector<4x128xf32>
    %7 = tpu.concatenate %2, %4, %6 in 1 : vector<4x128xf32>, vector<4x128xf32>, vector<4x128xf32> -> vector<4x384xf32>
    %8 = tpu.iota {dimensions = array<i32: 1>} : vector<1x128xi32>
    %9 = vector.broadcast %0 : i32 to vector<1x128xi32>
    %10 = arith.addi %8, %9 : vector<1x128xi32>
    %11 = arith.sitofp %10 : vector<1x128xi32> to vector<1x128xf32>
    %cst = arith.constant 6.250000e-02 : f32
    %12 = vector.broadcast %cst : f32 to vector<1x128xf32>
    %13 = arith.mulf %11, %12 : vector<1x128xf32>
    %14 = arith.fptosi %13 : vector<1x128xf32> to vector<1x128xi32>
    %c16_i32 = arith.constant 16 : i32
    %15 = vector.broadcast %c16_i32 : i32 to vector<1x128xi32>
    %16 = arith.muli %14, %15 : vector<1x128xi32>
    %17 = arith.subi %10, %16 : vector<1x128xi32>
    %c0_i32 = arith.constant 0 : i32
    %18 = vector.broadcast %c0_i32 : i32 to vector<1x128xi32>
    %19 = arith.cmpi slt, %17, %18 : vector<1x128xi32>
    %c16_i32_8 = arith.constant 16 : i32
    %20 = vector.broadcast %c16_i32_8 : i32 to vector<1x128xi32>
    %21 = arith.addi %17, %20 : vector<1x128xi32>
    %22 = arith.select %19, %21, %17 : vector<1x128xi1>, vector<1x128xi32>
    %c16_i32_9 = arith.constant 16 : i32
    %23 = vector.broadcast %c16_i32_9 : i32 to vector<1x128xi32>
    %24 = arith.cmpi sge, %22, %23 : vector<1x128xi32>
    %c16_i32_10 = arith.constant 16 : i32
    %25 = vector.broadcast %c16_i32_10 : i32 to vector<1x128xi32>
    %26 = arith.subi %22, %25 : vector<1x128xi32>
    %27 = arith.select %24, %26, %22 : vector<1x128xi1>, vector<1x128xi32>
    %c16_i32_11 = arith.constant 16 : i32
    %28 = vector.broadcast %c16_i32_11 : i32 to vector<1x128xi32>
    %29 = arith.cmpi sge, %10, %28 : vector<1x128xi32>
    %c240_i32 = arith.constant 240 : i32
    %30 = vector.broadcast %c240_i32 : i32 to vector<1x128xi32>
    %31 = arith.cmpi slt, %10, %30 : vector<1x128xi32>
    %c1_i32 = arith.constant 1 : i32
    %32 = vector.broadcast %c1_i32 : i32 to vector<1x128xi32>
    %33 = arith.cmpi sge, %27, %32 : vector<1x128xi32>
    %c14_i32 = arith.constant 14 : i32
    %34 = vector.broadcast %c14_i32 : i32 to vector<1x128xi32>
    %35 = arith.cmpi sle, %27, %34 : vector<1x128xi32>
    %c17_i32 = arith.constant 17 : i32
    %36 = tpu.dynamic_rotate %7 by %c17_i32 dim 1 : vector<4x384xf32>, i32 -> vector<4x384xf32>
    %37 = vector.extract_strided_slice %36 {offsets = [0, 128], sizes = [4, 128], strides = [1, 1]} : vector<4x384xf32> to vector<4x128xf32>
    %38 = arith.andi %29, %33 : vector<1x128xi1>
    %c0_i32_12 = arith.constant 0 : i32
    %39 = arith.sitofp %c0_i32_12 : i32 to f32
    %40 = vector.shape_cast %38 : vector<1x128xi1> to vector<1x128xi1>
    %41 = vector.broadcast %40 : vector<1x128xi1> to vector<4x128xi1>
    %42 = vector.broadcast %39 : f32 to vector<4x128xf32>
    %43 = arith.select %41, %37, %42 : vector<4x128xi1>, vector<4x128xf32>
    %c0_13 = arith.constant 0 : index
    %c0_14 = arith.constant 0 : index
    %44 = vector.load %arg7[%c0_13, %c0_14] : memref<37x128xf32, #tpu.memory_space<vmem>>, vector<4x128xf32>
    tpu.vector_store %arg7[%c0_13, %c0_14], %43 {strides = array<i32>} : memref<37x128xf32, #tpu.memory_space<vmem>>, vector<4x128xf32>,
    %c16_i32_15 = arith.constant 16 : i32
    %45 = tpu.dynamic_rotate %7 by %c16_i32_15 dim 1 : vector<4x384xf32>, i32 -> vector<4x384xf32>
    %46 = vector.extract_strided_slice %45 {offsets = [0, 128], sizes = [4, 128], strides = [1, 1]} : vector<4x384xf32> to vector<4x128xf32>
    %c0_i32_16 = arith.constant 0 : i32
    %47 = arith.sitofp %c0_i32_16 : i32 to f32
    %48 = vector.shape_cast %29 : vector<1x128xi1> to vector<1x128xi1>
    %49 = vector.broadcast %48 : vector<1x128xi1> to vector<4x128xi1>
    %50 = vector.broadcast %47 : f32 to vector<4x128xf32>
    %51 = arith.select %49, %46, %50 : vector<4x128xi1>, vector<4x128xf32>
    %c4 = arith.constant 4 : index
    %c0_17 = arith.constant 0 : index
    %52 = vector.load %arg7[%c4, %c0_17] : memref<37x128xf32, #tpu.memory_space<vmem>>, vector<4x128xf32>
    tpu.vector_store %arg7[%c4, %c0_17], %51 {strides = array<i32>} : memref<37x128xf32, #tpu.memory_space<vmem>>, vector<4x128xf32>,
    %c15_i32 = arith.constant 15 : i32
    %53 = tpu.dynamic_rotate %7 by %c15_i32 dim 1 : vector<4x384xf32>, i32 -> vector<4x384xf32>
    %54 = vector.extract_strided_slice %53 {offsets = [0, 128], sizes = [4, 128], strides = [1, 1]} : vector<4x384xf32> to vector<4x128xf32>
    %55 = arith.andi %29, %35 : vector<1x128xi1>
    %c0_i32_18 = arith.constant 0 : i32
    %56 = arith.sitofp %c0_i32_18 : i32 to f32
    %57 = vector.shape_cast %55 : vector<1x128xi1> to vector<1x128xi1>
    %58 = vector.broadcast %57 : vector<1x128xi1> to vector<4x128xi1>
    %59 = vector.broadcast %56 : f32 to vector<4x128xf32>
    %60 = arith.select %58, %54, %59 : vector<4x128xi1>, vector<4x128xf32>
    %c8 = arith.constant 8 : index
    %c0_19 = arith.constant 0 : index
    %61 = vector.load %arg7[%c8, %c0_19] : memref<37x128xf32, #tpu.memory_space<vmem>>, vector<4x128xf32>
    tpu.vector_store %arg7[%c8, %c0_19], %60 {strides = array<i32>} : memref<37x128xf32, #tpu.memory_space<vmem>>, vector<4x128xf32>,
    %c1_i32_20 = arith.constant 1 : i32
    %62 = tpu.dynamic_rotate %7 by %c1_i32_20 dim 1 : vector<4x384xf32>, i32 -> vector<4x384xf32>
    %63 = vector.extract_strided_slice %62 {offsets = [0, 128], sizes = [4, 128], strides = [1, 1]} : vector<4x384xf32> to vector<4x128xf32>
    %c0_i32_21 = arith.constant 0 : i32
    %64 = arith.sitofp %c0_i32_21 : i32 to f32
    %65 = vector.shape_cast %33 : vector<1x128xi1> to vector<1x128xi1>
    %66 = vector.broadcast %65 : vector<1x128xi1> to vector<4x128xi1>
    %67 = vector.broadcast %64 : f32 to vector<4x128xf32>
    %68 = arith.select %66, %63, %67 : vector<4x128xi1>, vector<4x128xf32>
    %c12 = arith.constant 12 : index
    %c0_22 = arith.constant 0 : index
    %69 = vector.load %arg7[%c12, %c0_22] : memref<37x128xf32, #tpu.memory_space<vmem>>, vector<4x128xf32>
    tpu.vector_store %arg7[%c12, %c0_22], %68 {strides = array<i32>} : memref<37x128xf32, #tpu.memory_space<vmem>>, vector<4x128xf32>,
    %c0_23 = arith.constant 0 : index
    %c0_24 = arith.constant 0 : index
    %c0_25 = arith.constant 0 : index
    %70 = vector.load %arg3[%c0_23, %c0_24, %c0_25] : memref<1x4x128xf32, #tpu.memory_space<vmem>>, vector<1x4x128xf32>
    %71 = vector.shape_cast %70 : vector<1x4x128xf32> to vector<4x128xf32>
    %c16 = arith.constant 16 : index
    %c0_26 = arith.constant 0 : index
    %72 = vector.load %arg7[%c16, %c0_26] : memref<37x128xf32, #tpu.memory_space<vmem>>, vector<4x128xf32>
    tpu.vector_store %arg7[%c16, %c0_26], %71 {strides = array<i32>} : memref<37x128xf32, #tpu.memory_space<vmem>>, vector<4x128xf32>,
    %c383_i32 = arith.constant 383 : i32
    %73 = tpu.dynamic_rotate %7 by %c383_i32 dim 1 : vector<4x384xf32>, i32 -> vector<4x384xf32>
    %74 = vector.extract_strided_slice %73 {offsets = [0, 128], sizes = [4, 128], strides = [1, 1]} : vector<4x384xf32> to vector<4x128xf32>
    %c0_i32_27 = arith.constant 0 : i32
    %75 = arith.sitofp %c0_i32_27 : i32 to f32
    %76 = vector.shape_cast %35 : vector<1x128xi1> to vector<1x128xi1>
    %77 = vector.broadcast %76 : vector<1x128xi1> to vector<4x128xi1>
    %78 = vector.broadcast %75 : f32 to vector<4x128xf32>
    %79 = arith.select %77, %74, %78 : vector<4x128xi1>, vector<4x128xf32>
    %c20 = arith.constant 20 : index
    %c0_28 = arith.constant 0 : index
    %80 = vector.load %arg7[%c20, %c0_28] : memref<37x128xf32, #tpu.memory_space<vmem>>, vector<4x128xf32>
    tpu.vector_store %arg7[%c20, %c0_28], %79 {strides = array<i32>} : memref<37x128xf32, #tpu.memory_space<vmem>>, vector<4x128xf32>,
    %c369_i32 = arith.constant 369 : i32
    %81 = tpu.dynamic_rotate %7 by %c369_i32 dim 1 : vector<4x384xf32>, i32 -> vector<4x384xf32>
    %82 = vector.extract_strided_slice %81 {offsets = [0, 128], sizes = [4, 128], strides = [1, 1]} : vector<4x384xf32> to vector<4x128xf32>
    %83 = arith.andi %31, %33 : vector<1x128xi1>
    %c0_i32_29 = arith.constant 0 : i32
    %84 = arith.sitofp %c0_i32_29 : i32 to f32
    %85 = vector.shape_cast %83 : vector<1x128xi1> to vector<1x128xi1>
    %86 = vector.broadcast %85 : vector<1x128xi1> to vector<4x128xi1>
    %87 = vector.broadcast %84 : f32 to vector<4x128xf32>
    %88 = arith.select %86, %82, %87 : vector<4x128xi1>, vector<4x128xf32>
    %c24 = arith.constant 24 : index
    %c0_30 = arith.constant 0 : index
    %89 = vector.load %arg7[%c24, %c0_30] : memref<37x128xf32, #tpu.memory_space<vmem>>, vector<4x128xf32>
    tpu.vector_store %arg7[%c24, %c0_30], %88 {strides = array<i32>} : memref<37x128xf32, #tpu.memory_space<vmem>>, vector<4x128xf32>,
    %c368_i32 = arith.constant 368 : i32
    %90 = tpu.dynamic_rotate %7 by %c368_i32 dim 1 : vector<4x384xf32>, i32 -> vector<4x384xf32>
    %91 = vector.extract_strided_slice %90 {offsets = [0, 128], sizes = [4, 128], strides = [1, 1]} : vector<4x384xf32> to vector<4x128xf32>
    %c0_i32_31 = arith.constant 0 : i32
    %92 = arith.sitofp %c0_i32_31 : i32 to f32
    %93 = vector.shape_cast %31 : vector<1x128xi1> to vector<1x128xi1>
    %94 = vector.broadcast %93 : vector<1x128xi1> to vector<4x128xi1>
    %95 = vector.broadcast %92 : f32 to vector<4x128xf32>
    %96 = arith.select %94, %91, %95 : vector<4x128xi1>, vector<4x128xf32>
    %c28 = arith.constant 28 : index
    %c0_32 = arith.constant 0 : index
    %97 = vector.load %arg7[%c28, %c0_32] : memref<37x128xf32, #tpu.memory_space<vmem>>, vector<4x128xf32>
    tpu.vector_store %arg7[%c28, %c0_32], %96 {strides = array<i32>} : memref<37x128xf32, #tpu.memory_space<vmem>>, vector<4x128xf32>,
    %c367_i32 = arith.constant 367 : i32
    %98 = tpu.dynamic_rotate %7 by %c367_i32 dim 1 : vector<4x384xf32>, i32 -> vector<4x384xf32>
    %99 = vector.extract_strided_slice %98 {offsets = [0, 128], sizes = [4, 128], strides = [1, 1]} : vector<4x384xf32> to vector<4x128xf32>
    %100 = arith.andi %31, %35 : vector<1x128xi1>
    %c0_i32_33 = arith.constant 0 : i32
    %101 = arith.sitofp %c0_i32_33 : i32 to f32
    %102 = vector.shape_cast %100 : vector<1x128xi1> to vector<1x128xi1>
    %103 = vector.broadcast %102 : vector<1x128xi1> to vector<4x128xi1>
    %104 = vector.broadcast %101 : f32 to vector<4x128xf32>
    %105 = arith.select %103, %99, %104 : vector<4x128xi1>, vector<4x128xf32>
    %c32 = arith.constant 32 : index
    %c0_34 = arith.constant 0 : index
    %106 = vector.load %arg7[%c32, %c0_34] : memref<37x128xf32, #tpu.memory_space<vmem>>, vector<4x128xf32>
    tpu.vector_store %arg7[%c32, %c0_34], %105 {strides = array<i32>} : memref<37x128xf32, #tpu.memory_space<vmem>>, vector<4x128xf32>,
    %cst_35 = arith.constant 1.000000e+00 : f32
    %107 = vector.broadcast %cst_35 : f32 to vector<1x128xf32>
    %c36 = arith.constant 36 : index
    %c0_36 = arith.constant 0 : index
    %108 = vector.load %arg7[%c36, %c0_36] : memref<37x128xf32, #tpu.memory_space<vmem>>, vector<1x128xf32>
    tpu.vector_store %arg7[%c36, %c0_36], %107 {strides = array<i32>} : memref<37x128xf32, #tpu.memory_space<vmem>>, vector<1x128xf32>,
    %c0_37 = arith.constant 0 : index
    %c0_38 = arith.constant 0 : index
    %109 = vector.load %arg5[%c0_37, %c0_38] : memref<8x37xf32, #tpu.memory_space<vmem>>, vector<8x37xf32>
    %c0_39 = arith.constant 0 : index
    %c0_40 = arith.constant 0 : index
    %110 = vector.load %arg7[%c0_39, %c0_40] : memref<37x128xf32, #tpu.memory_space<vmem>>, vector<37x128xf32>
    %cst_41 = arith.constant dense<0.000000e+00> : vector<8x128xf32>
    %111 = tpu.matmul %109, %110, %cst_41 {dimension_numbers = #tpu.dot_dimension_numbers<[1], [0], [0], [1], [0, 0, 1, 1], [], []>} : vector<8x37xf32>, vector<37x128xf32>, vector<8x128xf32> -> vector<8x128xf32>
    %c0_42 = arith.constant 0 : index
    %c0_43 = arith.constant 0 : index
    %c0_44 = arith.constant 0 : index
    %112 = vector.load %arg6[%c0_42, %c0_43, %c0_44] : memref<1x8x128xf32, #tpu.memory_space<vmem>>, vector<1x8x128xf32>
    %113 = vector.shape_cast %112 : vector<1x8x128xf32> to vector<8x128xf32>
    %114 = vector.shape_cast %111 : vector<8x128xf32> to vector<1x8x128xf32>
    tpu.vector_store %arg6[%c0_42, %c0_43, %c0_44], %114 {strides = array<i32>} : memref<1x8x128xf32, #tpu.memory_space<vmem>>, vector<1x8x128xf32>,
    return
  }
  func.func @transform_0(%arg0: i32, %arg1: i32) -> (i32, i32, i32) {
    %c1_i32 = arith.constant 1 : i32
    %0 = arith.muli %arg1, %c1_i32 : i32
    %c1_i32_0 = arith.constant 1 : i32
    %1 = arith.subi %0, %c1_i32_0 : i32
    %c0_i32 = arith.constant 0 : i32
    %2 = arith.maxsi %1, %c0_i32 : i32
    %c0_i32_1 = arith.constant 0 : i32
    %c0_i32_2 = arith.constant 0 : i32
    return %arg0, %c0_i32_1, %2 : i32, i32, i32
  }
  func.func @transform_1(%arg0: i32, %arg1: i32) -> (i32, i32, i32) {
    %c0_i32 = arith.constant 0 : i32
    %c0_i32_0 = arith.constant 0 : i32
    return %arg0, %c0_i32, %arg1 : i32, i32, i32
  }
  func.func @transform_2(%arg0: i32, %arg1: i32) -> (i32, i32, i32) {
    %c1_i32 = arith.constant 1 : i32
    %0 = arith.addi %arg1, %c1_i32 : i32
    %c1_i32_0 = arith.constant 1 : i32
    %1 = arith.muli %0, %c1_i32_0 : i32
    %c1_i32_1 = arith.constant 1 : i32
    %2 = arith.minsi %1, %c1_i32_1 : i32
    %c0_i32 = arith.constant 0 : i32
    %c0_i32_2 = arith.constant 0 : i32
    return %arg0, %c0_i32, %2 : i32, i32, i32
  }
  func.func @transform_3(%arg0: i32, %arg1: i32) -> (i32, i32) {
    %c0_i32 = arith.constant 0 : i32
    %c0_i32_0 = arith.constant 0 : i32
    %c0_i32_1 = arith.constant 0 : i32
    return %c0_i32, %c0_i32_0 : i32, i32
  }
  func.func @transform_4(%arg0: i32, %arg1: i32) -> (i32, i32, i32) {
    %c0_i32 = arith.constant 0 : i32
    %c0_i32_0 = arith.constant 0 : i32
    return %arg0, %c0_i32, %arg1 : i32, i32, i32
  }
}

</mosaic_0001>

<bundles_post_ra>
// kernel: _lambda_.1
= control target key start
LH: loop header
LB: loop body
LE: loop exit
PB: predicated region body
PF: predicated region fallthrough
CT: control target
= control target key end

     0   :  { %s838_s15 = smov 0   ;;  %s840_s16 = smov 0   ;;  %s948_s0 = inlined_call_operand.vmem [shape: f32[2,4,256], index: 0, kind: input, shape index: {}, may-alias: {0,1,2}]   ;;  %s949_s1 = inlined_call_operand.vmem [shape: f32[2,4,256], index: 1, kind: input, shape index: {}, may-alias: {0,1,2}]   ;;  %s950_s2 = inlined_call_operand.vmem [shape: f32[2,4,256], index: 2, kind: input, shape index: {}, may-alias: {0,1,2}]   ;;  %s951_s3 = inlined_call_operand.vmem [shape: f32[8,37], index: 3, kind: input, shape index: {}]   ;;  %s952_s4 = inlined_call_operand.vmem [shape: f32[2,8,256], index: 4, kind: output, shape index: {}]  }
   0x1   :  { %s842_s17 = smov 0   ;;  %s844_s18 = smov 0  }
   0x2   :  { %s846_s19 = smov 0  }
   0x3 LB: > { %s23_s20 = sadd.s32 1, %s791_s17  ;;  %s26_s21 = sadd.s32 1, %s795_s18  ;;  %s799_s19 = sphi %s846_s19, %s14_s19   ;;  %s795_s18 = sphi %s844_s18, %s956_s18   ;;  %s791_s17 = sphi %s842_s17, %s955_s17   ;;  %s787_s16 = sphi %s840_s16, %s954_s16   ;;  %s783_s15 = sphi %s838_s15, %s953_s15  }
   0x4   : > { %p24_p0 = scmp.ge.s32.totalorder %s23_s20, 2  ;;  %p656_p1 = scmp.ge.s32.totalorder %s799_s19, 1 }
   0x5   : > { %p235_p2 = scmp.lt.s32.totalorder %s799_s19, 5 }
   0x6   : > { %s958_s20 = smov (%p24_p0, %s23_s20), 0  ;;  %s960_s21 = smov (!%p24_p0, %s26_s21), %s795_s18 }
   0x7   : > { %p236_p3 = pnand %p656_p1, %p235_p2  ;;  %p28_p4 = scmp.ge.s32.totalorder %s960_s21, 2 }
   0x8   : > { %p292_p5 = scmp.lt.s32.totalorder (!%p236_p3), %s787_s16, 1  ;;  %p305_p6 = scmp.lt.s32.totalorder (!%p236_p3), %s783_s15, 1  ;;  %v805_v4 = vmov (!%p236_p3), 0.0|0.0   ;;  %v808_v5 = vmov (!%p236_p3), 1.0   ;;  %vm811_vm0 = vmmov (!%p236_p3), 0   ;;  %v812_v6 = vmov (!%p236_p3), 0.0  }
   0x9   : > { %s962_s21 = smov (%p28_p4, %s960_s21), 0  ;;  %239 = sbr.rel (%p236_p3) target bundleno = 392 (0x188), region = 36 }
   0xa   : > { %s657_s25 = sadd.s32 (!%p236_p3), 4294967295, %s783_s15  ;;  %s801_s30 = smov (!%p236_p3), 16   ;;  %701 = vmatprep.subr.bf16.mxu0 (!%p236_p3), %v805_v4  ;;  %442 = vst [vmem:[#allocation2 + $0x24] sm:$0x1] (!%p236_p3), %v808_v5  ;;  %698 = vmatprep.mubr.msk.f32.mxu0 (!%p236_p3), %vm811_vm0, %v812_v6  ;;  %v337_v7 = vlaneseq (!%p236_p3)  ;;  %v443_v60 = vld [vmem:[%s951_s3] sm:$0xff] (!%p236_p3) }
   0xb   : > { %p290_p7 = scmp.gt.s32.totalorder (!%p236_p3), %s657_s25, 0  ;;  %p658_p8 = scmp.lt.s32.totalorder (!%p236_p3), %s657_s25, 1 }
   0xc   : > { %s802_s5 = smov (!%p236_p3), 17   ;;  %s311_s6 = sadd.s32 (!%p236_p3), 1, %s783_s15  ;;  %v889_v8 = vand.u32 (!%p236_p3), 127, %v337_v7 }
   0xd   : > { %p312_p9 = scmp.lt.s32.totalorder (!%p236_p3), %s311_s6, 1  ;;  %s803_s8 = smov (!%p236_p3), 15  }
   0xe   : > { %s806_s27 = smov (!%p236_p3), 127   ;;  %s807_s28 = smov (!%p236_p3), 113   ;;  %vm360_vm5 = vcmp.lt.s32.totalorder (!%p236_p3), %v889_v8, 17  ;;  %vm371_vm7 = vcmp.lt.s32.totalorder (!%p236_p3), %v889_v8, 16  ;;  %vm381_vm9 = vcmp.lt.s32.totalorder (!%p236_p3), %v889_v8, 15  ;;  %vm392_vm11 = vcmp.lt.s32.totalorder (!%p236_p3), %v889_v8, 1 }
   0xf   : > { %vm404_vm12 = vcmp.lt.s32.totalorder (!%p236_p3), %v889_v8, 127  ;;  %vm414_vm14 = vcmp.lt.s32.totalorder (!%p236_p3), %v889_v8, 113  ;;  %vm425_vm0 = vcmp.lt.s32.totalorder (!%p236_p3), %v889_v8, 112 }
  0x10   : > { %s964_s16 = smov (!%p292_p5, %s787_s16), 1  ;;  %s966_s25 = smov (!%p290_p7, %s657_s25), 0 }
  0x11   : > { %s306_s22 = scalar_select %p305_p6, %s783_s15, 1 }
  0x12   : > { %s663_s23 = sshll.u32 %s964_s16, 1  ;;  %s968_s25 = smov (!%p658_p8, %s966_s25), 1 }
  0x13   : > { %s872_s24 = sadd.s32 %s663_s23, %s306_s22  ;;  %s297_s7 = sadd.s32 %s968_s25, %s663_s23 }
  0x14   : > { %s666_s26 = sshll.u32 %s872_s24, 2  ;;  %s664_s9 = sshll.u32 %s297_s7, 2 }
  0x15   : > { %s310_s29 = scalar_lea.vmem %s949_s1, %s666_s26  ;;  %s299_s12 = scalar_lea.vmem %s948_s0, %s664_s9 }
  0x16   : > { %v335_v0 = vld [vmem:[%s310_s29] sm:$0xf]  ;;  %s970_s6 = smov (!%p312_p9, %s311_s6), 1  ;;  %s804_s16 = smov 1  }
  0x17   : > { %v398_v1 = vld [vmem:[%s310_s29] sm:$0xf]  ;;  %369 = vrot.lane.b32.xlu1 %v335_v0, %s801_s30  ;;  %358 = vrot.lane.b32.xlu0 %v335_v0, %s802_s5  ;;  %s972_s6 = smov (!%p312_p9, %s970_s6), 1  ;;  %s810_s29 = smov 111  }
  0x18   : > { %399 = vst [vmem:[#allocation2 + $0x10] sm:$0xf] %v398_v1  ;;  %v334_v2 = vld [vmem:[%s299_s12] sm:$0xf]  ;;  %s319_s13 = sadd.s32 %s663_s23, %s972_s6  ;;  %s809_s23 = smov 112  }
  0x19   : > { %s671_s14 = sshll.u32 %s319_s13, 2  ;;  %s673_s6 = sshll.u32 %s872_s24, 3 }
  0x1a   : > { %s321_s25 = scalar_lea.vmem %s950_s2, %s671_s14  ;;  %s332_s9 = scalar_lea.vmem %s952_s4, %s673_s6 }
  0x1b   : > { %379 = vrot.lane.b32.xlu1 %v335_v0, %s803_s8  ;;  %356 = vrot.lane.b32.xlu0 %v334_v2, %s802_s5  ;;  %v336_v3 = vld [vmem:[%s321_s25] sm:$0xf] }
  0x1f   : > { %367 = vrot.lane.b32.xlu1 %v334_v2, %s801_s30  ;;  %377 = vrot.lane.b32.xlu0 %v334_v2, %s803_s8  ;;  %s674_s30 = sshll.u32 %s783_s15, 7 }
  0x20   : > { %v339_v9 = vstv %s674_s30 }
  0x21   : > { %v892_v10 = vadd.s32 %v339_v9, %v889_v8 }
  0x23   : > { %390 = vrot.lane.b32.xlu1 %v335_v0, %s804_s16  ;;  %388 = vrot.lane.b32.xlu0 %v334_v2, %s804_s16  ;;  %v341_v11 = vcvt.s32.f32 %v892_v10  ;;  %vm352_vm3 = vcmp.ge.s32.totalorder %v892_v10, 16  ;;  %vm353_vm13 = vcmp.lt.s32.totalorder %v892_v10, 240 }
  0x25   : > { %v342_v12 = vmul.f32 0.0625, %v341_v11 }
  0x27   : > { %402 = vrot.lane.b32.xlu1 %v336_v3, %s806_s27  ;;  %400 = vrot.lane.b32.xlu0 %v335_v0, %s806_s27  ;;  %v707_v13 = vtrunc.f32 %v342_v12 }
  0x29   : > { %v708_v14 = vcvt.f32.s32 %v707_v13 }
  0x2b   : > { %412 = vrot.lane.b32.xlu1 %v336_v3, %s807_s28  ;;  %410 = vrot.lane.b32.xlu0 %v335_v0, %s807_s28  ;;  %v344_v15 = vmul.u32 16, %v708_v14 }
  0x2d   : > { %v345_v16 = vsub.s32 %v892_v10, %v344_v15 }
  0x2f   : > { %423 = vrot.lane.b32.xlu1 %v336_v3, %s809_s23  ;;  %421 = vrot.lane.b32.xlu0 %v335_v0, %s809_s23  ;;  %v347_v17 = vadd.s32 16, %v345_v16  ;;  %vm346_vm1 = vcmp.lt.s32.totalorder %v345_v16, 0 }
  0x31   : > { %v348_v18 = vsel %vm346_vm1, %v347_v17, %v345_v16  ;;  %vm435_vm1 = vcmp.lt.s32.totalorder %v889_v8, 111 }
  0x32   : > { %v675_v19 = vadd.s32 4294967280, %v348_v18  ;;  %vm349_vm2 = vcmp.ge.s32.totalorder %v348_v18, 16 }
  0x33   : > { %433 = vrot.lane.b32.xlu1 %v336_v3, %s810_s29  ;;  %431 = vrot.lane.b32.xlu0 %v335_v0, %s810_s29 }
  0x34   : > { %v351_v21 = vsel %vm349_vm2, %v675_v19, %v348_v18 }
  0x35   : > { %vm354_vm4 = vcmp.ge.s32.totalorder %v351_v21, 1  ;;  %vm355_vm8 = vcmp.le.s32.totalorder %v351_v21, 14 }
  0x36   : > { %vm362_vm6 = vmand %vm352_vm3, %vm354_vm4 }
  0x37   : > { %vm383_vm10 = vmand %vm352_vm3, %vm355_vm8 }
  0x38   : > { %vm416_vm15 = vmand %vm353_vm13, %vm354_vm4 }
  0x39   : > { %vm437_vm2 = vmand %vm353_vm13, %vm355_vm8 }
  0x89   : > { %v370_v20 = vpop.permute.xlu1 %369  ;;  %v359_v22 = vpop.permute.xlu0 %358 }
  0x8d   : > { %v380_v23 = vpop.permute.xlu1 %379  ;;  %v357_v24 = vpop.permute.xlu0 %356 }
  0x8e   : > { %v361_v25 = vsel %vm360_vm5, %v357_v24, %v359_v22 }
  0x8f   : > { %v365_v27 = vsel %vm362_vm6, %v361_v25, 0.0 }
  0x90   : > { %366 = vst [vmem:[#allocation2] sm:$0xf] %v365_v27 }
  0x91   : > { %v368_v26 = vpop.permute.xlu1 %367  ;;  %v378_v30 = vpop.permute.xlu0 %377 }
  0x92   : > { %v372_v28 = vsel %vm371_vm7, %v368_v26, %v370_v20  ;;  %v382_v31 = vsel %vm381_vm9, %v378_v30, %v380_v23 }
  0x93   : > { %v375_v29 = vsel %vm352_vm3, %v372_v28, 0.0  ;;  %v386_v33 = vsel %vm383_vm10, %v382_v31, 0.0  ;;  %vm453_vm3 = vcmask 1044480  }
  0x94   : > { %376 = vst [vmem:[#allocation2 + $0x4] sm:$0xf] %v375_v29  ;;  %387 = vst [vmem:[#allocation2 + $0x8] sm:$0xf] %v386_v33 }
  0x95   : > { %v391_v32 = vpop.permute.xlu1 %390  ;;  %v389_v34 = vpop.permute.xlu0 %388 }
  0x96   : > { %v393_v35 = vsel %vm392_vm11, %v389_v34, %v391_v32 }
  0x97   : > { %v396_v37 = vsel %vm354_vm4, %v393_v35, 0.0  ;;  %vm449_vm4 = vcmask 302080  }
  0x98   : > { %397 = vst [vmem:[#allocation2 + $0xc] sm:$0xf] %v396_v37 }
  0x99   : > { %v403_v36 = vpop.permute.xlu1 %402  ;;  %v401_v38 = vpop.permute.xlu0 %400 }
  0x9a   : > { %v405_v39 = vsel %vm404_vm12, %v401_v38, %v403_v36 }
  0x9b   : > { %v408_v41 = vsel %vm355_vm8, %v405_v39, 0.0  ;;  %v444_v46 = vld [vmem:[#allocation2] sm:$0xff] }
  0x9c   : > { %409 = vst [vmem:[#allocation2 + $0x14] sm:$0xf] %v408_v41 }
  0x9d   : > { %v413_v40 = vpop.permute.xlu1 %412  ;;  %v411_v42 = vpop.permute.xlu0 %410 }
  0x9e   : > { %v415_v43 = vsel %vm414_vm14, %v411_v42, %v413_v40 }
  0x9f   : > { %v419_v44 = vsel %vm416_vm15, %v415_v43, 0.0  ;;  %v445_v47 = vld [vmem:[#allocation2 + $0x8] sm:$0xff] }
  0xa0   : > { %420 = vst [vmem:[#allocation2 + $0x18] sm:$0xf] %v419_v44  ;;  %v702_v48 = vpack.c.bf16 %v445_v47, %v444_v46 }
  0xa1   : > { %v424_v45 = vpop.permute.xlu1 %423  ;;  %v422_v49 = vpop.permute.xlu0 %421 }
  0xa2   : > { %v426_v50 = vsel %vm425_vm0, %v422_v49, %v424_v45  ;;  %703 = vmatpush3.bf16.msra.mxu0 %v702_v48 }
  0xa3   : > { %v429_v51 = vsel %vm353_vm13, %v426_v50, 0.0  ;;  %704 = vmatprep.subr.bf16.mxu0 %v805_v4  ;;  %v446_v56 = vld [vmem:[#allocation2 + $0x10] sm:$0xff] }
  0xa4   : > { %430 = vst [vmem:[#allocation2 + $0x1c] sm:$0xf] %v429_v51 }
  0xa5   : > { %v434_v52 = vpop.permute.xlu1 %433  ;;  %v432_v53 = vpop.permute.xlu0 %431 }
  0xa6   : > { %v436_v54 = vsel %vm435_vm1, %v432_v53, %v434_v52 }
  0xa7   : > { %v440_v55 = vsel %vm437_vm2, %v436_v54, 0.0 }
  0xa8   : > { %441 = vst [vmem:[#allocation2 + $0x20] sm:$0xf] %v440_v55 }
  0xab   : > { %v447_v57 = vld [vmem:[#allocation2 + $0x18] sm:$0xff] }
  0xac   : > { %v705_v58 = vpack.c.bf16 %v447_v57, %v446_v56 }
  0xae   : > { %706 = vmatpush3.bf16.msra.mxu0 %v705_v58 }
  0xaf   : > { %696 = vmatprep.subr.mxu0 %v812_v6  ;;  %v448_v59 = vld [vmem:[#allocation2 + $0x20] sm:$0x1f] }
  0xb2   : > { %697 = vmatpush3.msk.msra.mxu0 %vm453_vm3, %v448_v59 }
  0xb3   : > { %699 = vmatmul.mubr.msk.f32.vlgmr.msra.gmra.mrb[0].mxu0 %vm449_vm4, %v443_v60 }
 0x186   : > { %v523_v61 = vpop.f32.mrb[0].mxu0 }
 0x187   : > { %527 = vst [vmem:[%s332_s9] sm:$0xff] %v523_v61  ;;  %v700_v62 = vpop.f32.mrb[1].mxu0 }
 0x188 PF: > { %s14_s19 = sadd.s32 1, %s799_s19   ;;  %s953_s15 = smov %s791_s17 }
 0x189   : > { %p11_p10 = scmp.ge.s32.totalorder %s14_s19, 6   ;;  %s954_s16 = smov %s795_s18 }
 0x18a   : > { %s955_s17 = smov %s958_s20  ;;  %s956_s18 = smov %s962_s21 }
 0x18b   :  { %13 = sbr.rel (!%p11_p10) target bundleno = 3 (0x3), region = 72 }

</bundles_post_ra>
